<compile_context>
chip_gen: v6e
topology: v6e:2x2x1
jax: 0.10.0
libtpu: 0.0.40
codegen_flags: <defaults>
</compile_context>

<pallas_src>
import functools

import jax
import jax.numpy as jnp
from jax import lax
from jax.experimental import pallas as pl
from jax.experimental.pallas import tpu as pltpu

_LANES = 128
_DEFAULT_BLOCK_ROWS = 4096   # 4096x128 f32 = 2 MiB per block
_N_SPLITS = 2                # leading "parallel" axis -> both TCs on v7x


def _dice_partial_kernel(x_ref, t_ref, out_ref, acc_i_ref, acc_s_ref, *,
                         tb, steps_per_split, total_steps, total, ragged):
    c = pl.program_id(0)            # split index (a TensorCore on v7x)
    s = pl.program_id(1)            # step within the split (reduction axis)
    g = c * steps_per_split + s     # intended global block index
    block_elems = tb * _LANES

    @pl.when(s == 0)
    def _init():
        acc_i_ref[...] = jnp.zeros_like(acc_i_ref)
        acc_s_ref[...] = jnp.zeros_like(acc_s_ref)

    # Uneven splits clamp their extra block index in the index_map; skip the
    # duplicated block here so it contributes nothing.
    @pl.when(g < total_steps)
    def _accumulate():
        x = x_ref[...].astype(jnp.float32)
        t = t_ref[...].astype(jnp.float32)
        # sigmoid: exp + approximate reciprocal, both on the EUP slot, so the
        # VALU stays free and the kernel remains DMA-bound.
        p = pl.reciprocal(1.0 + jnp.exp(-x), approx=True)

        if ragged:
            # Mask out the wrapper's small zero-pad and any garbage from a
            # partially out-of-bounds last block. Only ragged sizes pay this.
            # TODO(synk): int32 element indices cap this at 2^31 elements.
            limit = jnp.where(g == total_steps - 1,
                              total - g * block_elems, block_elems)
            idx = (lax.broadcasted_iota(jnp.int32, (tb, _LANES), 0) * _LANES
                   + lax.broadcasted_iota(jnp.int32, (tb, _LANES), 1))
            valid = idx < limit
            p = jnp.where(valid, p, 0.0)
            t = jnp.where(valid, t, 0.0)

        # Vector accumulators: per step only vreg-wise VPU adds; the cross-lane
        # reduction to a scalar happens once, in _finalize.
        acc_i_ref[...] += jnp.sum((p * t).reshape(tb // 8, 8, _LANES), axis=0)
        acc_s_ref[...] += jnp.sum((p + t).reshape(tb // 8, 8, _LANES), axis=0)

    @pl.when(s == steps_per_split - 1)
    def _finalize():
        out_ref[0, 0] = jnp.sum(acc_i_ref[...])   # intersection partial
        out_ref[0, 1] = jnp.sum(acc_s_ref[...])   # sum(p) + sum(t) partial


def dice_loss(inputs, targets, smooth=1.0, *, block_rows=_DEFAULT_BLOCK_ROWS):
    assert inputs.shape == targets.shape, (inputs.shape, targets.shape)

    x = inputs.reshape(-1)
    t = targets.reshape(-1)          # keep native dtype -> fewer HBM bytes

    # Row alignment that respects sublane packing of BOTH dtypes
    # (f32 -> 8 rows, bf16 -> 16, int8/bool -> 32).
    row_align = max(32 // x.dtype.itemsize, 32 // t.dtype.itemsize, 8)
    align_elems = row_align * _LANES

    total = x.shape[0]
    padded_total = -(-total // align_elems) * align_elems
    pad = padded_total - total
    if pad:
        # Pad only to packing granularity (<= a few KiB); the kernel masks the
        # tail so pad values never reach the sums. Nicely shaped tensors skip
        # this copy entirely.
        x = jnp.pad(x, (0, pad))
        t = jnp.pad(t, (0, pad))
    rows = padded_total // _LANES

    tb = min(int(block_rows), rows)
    tb = max(row_align, (tb // row_align) * row_align)

    total_steps = -(-rows // tb)
    n_splits = _N_SPLITS if total_steps >= _N_SPLITS else 1
    steps_per_split = -(-total_steps // n_splits)
    ragged = (total != total_steps * tb * _LANES)

    x2 = x.reshape(rows, _LANES)
    t2 = t.reshape(rows, _LANES)

    def in_map(c, s):
        g = c * steps_per_split + s
        # Clamp so an uneven split never requests a fully out-of-range block;
        # the kernel skips (and zero-weights) the duplicate.
        return (jnp.minimum(g, total_steps - 1), 0)

    kernel = functools.partial(
        _dice_partial_kernel, tb=tb, steps_per_split=steps_per_split,
        total_steps=total_steps, total=total, ragged=ragged)

    # Raise the scoped VMEM limit only if the in-flight buffers need it
    # (e.g. block_rows=8192 with f32 targets on v5e).
    bytes_in_flight = 2 * tb * _LANES * (x.dtype.itemsize + t.dtype.itemsize)
    vmem_limit = None
    if bytes_in_flight > (14 << 20):
        vmem_limit = min(bytes_in_flight + (4 << 20), 48 << 20)

    partials = pl.pallas_call(
        kernel,
        out_shape=jax.ShapeDtypeStruct((n_splits, 2), jnp.float32),
        grid=(n_splits, steps_per_split),
        in_specs=[
            pl.BlockSpec((tb, _LANES), in_map),
            pl.BlockSpec((tb, _LANES), in_map),
        ],
        out_specs=pl.BlockSpec((1, 2), lambda c, s: (c, 0),
                               memory_space=pltpu.MemorySpace.SMEM),
        scratch_shapes=[pltpu.VMEM((8, _LANES), jnp.float32),
                        pltpu.VMEM((8, _LANES), jnp.float32)],
        compiler_params=pltpu.CompilerParams(
            dimension_semantics=("parallel", "arbitrary"),
            vmem_limit_bytes=vmem_limit),
    )(x2, t2)

    inter = partials[:, 0].sum()
    p_plus_t = partials[:, 1].sum()
    smooth = jnp.float32(smooth)
    dice = (2.0 * inter + smooth) / (p_plus_t + smooth)
    return 1.0 - dice


class DiceLossPallas:
    """JAX/Pallas port of the torch DiceLoss module."""

    def __init__(self, weight=None, size_average=True):
        # mirrors torch __init__: both args accepted and ignored
        del weight, size_average

    def __call__(self, inputs, targets, smooth=1):
        return dice_loss(inputs, targets, smooth=smooth)


def _reference(inputs, targets, smooth=1.0):
    p = jax.nn.sigmoid(inputs.astype(jnp.float32)).reshape(-1)
    t = targets.astype(jnp.float32).reshape(-1)
    inter = jnp.sum(p * t)
    return 1.0 - (2.0 * inter + smooth) / (jnp.sum(p) + jnp.sum(t) + smooth)


if __name__ == "__main__":
    key = jax.random.PRNGKey(0)
    k_in, k_tg, k_in2, k_tg2 = jax.random.split(key, 4)

    # Small segmentation-style shapes: batch=2, channels=4, 16x16 spatial.
    B, C, H, W = 2, 4, 16, 16
    inputs = jax.random.normal(k_in, (B, C, H, W), dtype=jnp.float32)
    targets = (jax.random.uniform(k_tg, (B, C, H, W)) > 0.5).astype(jnp.float32)

    loss_fn = DiceLossPallas()
    loss = loss_fn(inputs, targets)
    jax.block_until_ready(loss)
    assert loss.shape == ()
    assert abs(float(loss) - float(_reference(inputs, targets))) < 2e-3

    # Second check: ragged total size + native narrow-dtype targets + tiny tile
    # exercises the multi-step grid, the 2-way "parallel" split (with an
    # uneven, clamped-and-skipped duplicate block) and the in-kernel tail mask.
    inputs2 = jax.random.normal(k_in2, (3, 5, 17, 19), dtype=jnp.float32)
    targets2 = (jax.random.uniform(k_tg2, (3, 5, 17, 19)) > 0.5).astype(jnp.bfloat16)
    loss2 = dice_loss(inputs2, targets2, smooth=1.0, block_rows=16)
    jax.block_until_ready(loss2)
    assert abs(float(loss2) - float(_reference(inputs2, targets2))) < 2e-3

    print("KERNEL_OK")
</pallas_src>

<mosaic_0001>
module attributes {stable_mosaic.version = 11 : i64} {
  func.func @_dice_partial_kernel(%arg0: i32, %arg1: i32, %arg2: memref<16x128xf32, #tpu.memory_space<vmem>>, %arg3: memref<16x128xf32, #tpu.memory_space<vmem>>, %arg4: memref<1x2xf32, #tpu.memory_space<smem>>, %arg5: memref<8x128xf32, #tpu.memory_space<vmem>>, %arg6: memref<8x128xf32, #tpu.memory_space<vmem>>) attributes {dimension_semantics = [#tpu.dimension_semantics<parallel>, #tpu.dimension_semantics<arbitrary>], iteration_bounds = array<i64: 1, 1>, scalar_prefetch = 0 : i64, scratch_operands = 2 : i64, tpu.core_type = #tpu.core_type<tc>, window_params = [{transform_indices = @transform_0, window_bounds = array<i64: 16, 128>}, {transform_indices = @transform_1, window_bounds = array<i64: 16, 128>}, {transform_indices = @transform_2, window_bounds = array<i64: 1, 2>}]} {
    %c1_i32 = arith.constant 1 : i32
    %0 = arith.muli %arg0, %c1_i32 : i32
    %1 = arith.addi %0, %arg1 : i32
    %c0_i32 = arith.constant 0 : i32
    %2 = arith.cmpi eq, %arg1, %c0_i32 : i32
    %3 = arith.extui %2 : i1 to i32
    %c0_i32_0 = arith.constant 0 : i32
    %4 = arith.cmpi ne, %3, %c0_i32_0 : i32
    scf.if %4 {
      %cst = arith.constant 0.000000e+00 : f32
      %11 = vector.broadcast %cst : f32 to vector<8x128xf32>
      %c0 = arith.constant 0 : index
      %c0_5 = arith.constant 0 : index
      %12 = vector.load %arg5[%c0, %c0_5] : memref<8x128xf32, #tpu.memory_space<vmem>>, vector<8x128xf32>
      tpu.vector_store %arg5[%c0, %c0_5], %11 {strides = array<i32>} : memref<8x128xf32, #tpu.memory_space<vmem>>, vector<8x128xf32>,
      %cst_6 = arith.constant 0.000000e+00 : f32
      %13 = vector.broadcast %cst_6 : f32 to vector<8x128xf32>
      %c0_7 = arith.constant 0 : index
      %c0_8 = arith.constant 0 : index
      %14 = vector.load %arg6[%c0_7, %c0_8] : memref<8x128xf32, #tpu.memory_space<vmem>>, vector<8x128xf32>
      tpu.vector_store %arg6[%c0_7, %c0_8], %13 {strides = array<i32>} : memref<8x128xf32, #tpu.memory_space<vmem>>, vector<8x128xf32>,
    } else {
    }
    %c1_i32_1 = arith.constant 1 : i32
    %5 = arith.cmpi slt, %1, %c1_i32_1 : i32
    %6 = arith.extui %5 : i1 to i32
    %c0_i32_2 = arith.constant 0 : i32
    %7 = arith.cmpi ne, %6, %c0_i32_2 : i32
    scf.if %7 {
      %c0 = arith.constant 0 : index
      %c0_5 = arith.constant 0 : index
      %11 = vector.load %arg2[%c0, %c0_5] : memref<16x128xf32, #tpu.memory_space<vmem>>, vector<16x128xf32>
      %c0_6 = arith.constant 0 : index
      %c0_7 = arith.constant 0 : index
      %12 = vector.load %arg3[%c0_6, %c0_7] : memref<16x128xf32, #tpu.memory_space<vmem>>, vector<16x128xf32>
      %cst = arith.constant 0.000000e+00 : f32
      %13 = vector.broadcast %cst : f32 to vector<16x128xf32>
      %14 = arith.subf %13, %11 : vector<16x128xf32>
      %15 = math.exp %14 : vector<16x128xf32>
      %cst_8 = arith.constant 1.000000e+00 : f32
      %16 = vector.broadcast %cst_8 : f32 to vector<16x128xf32>
      %17 = arith.addf %16, %15 : vector<16x128xf32>
      %18 = tpu.reciprocal %17 {approx = true} : vector<16x128xf32> -> vector<16x128xf32>
      %c0_9 = arith.constant 0 : index
      %c0_10 = arith.constant 0 : index
      %19 = vector.load %arg5[%c0_9, %c0_10] : memref<8x128xf32, #tpu.memory_space<vmem>>, vector<8x128xf32>
      %20 = arith.mulf %18, %12 : vector<16x128xf32>
      %21 = vector.shape_cast %20 : vector<16x128xf32> to vector<2x8x128xf32>
      %cst_11 = arith.constant dense<0.000000e+00> : vector<8x128xf32>
      %22 = vector.multi_reduction <add>, %21, %cst_11 [0] : vector<2x8x128xf32> to vector<8x128xf32>
      %23 = arith.addf %19, %22 : vector<8x128xf32>
      %c0_12 = arith.constant 0 : index
      %c0_13 = arith.constant 0 : index
      %24 = vector.load %arg5[%c0_12, %c0_13] : memref<8x128xf32, #tpu.memory_space<vmem>>, vector<8x128xf32>
      tpu.vector_store %arg5[%c0_12, %c0_13], %23 {strides = array<i32>} : memref<8x128xf32, #tpu.memory_space<vmem>>, vector<8x128xf32>,
      %c0_14 = arith.constant 0 : index
      %c0_15 = arith.constant 0 : index
      %25 = vector.load %arg6[%c0_14, %c0_15] : memref<8x128xf32, #tpu.memory_space<vmem>>, vector<8x128xf32>
      %26 = arith.addf %18, %12 : vector<16x128xf32>
      %27 = vector.shape_cast %26 : vector<16x128xf32> to vector<2x8x128xf32>
      %cst_16 = arith.constant dense<0.000000e+00> : vector<8x128xf32>
      %28 = vector.multi_reduction <add>, %27, %cst_16 [0] : vector<2x8x128xf32> to vector<8x128xf32>
      %29 = arith.addf %25, %28 : vector<8x128xf32>
      %c0_17 = arith.constant 0 : index
      %c0_18 = arith.constant 0 : index
      %30 = vector.load %arg6[%c0_17, %c0_18] : memref<8x128xf32, #tpu.memory_space<vmem>>, vector<8x128xf32>
      tpu.vector_store %arg6[%c0_17, %c0_18], %29 {strides = array<i32>} : memref<8x128xf32, #tpu.memory_space<vmem>>, vector<8x128xf32>,
    } else {
    }
    %c0_i32_3 = arith.constant 0 : i32
    %8 = arith.cmpi eq, %arg1, %c0_i32_3 : i32
    %9 = arith.extui %8 : i1 to i32
    %c0_i32_4 = arith.constant 0 : i32
    %10 = arith.cmpi ne, %9, %c0_i32_4 : i32
    scf.if %10 {
      %c0 = arith.constant 0 : index
      %c0_5 = arith.constant 0 : index
      %11 = vector.load %arg5[%c0, %c0_5] : memref<8x128xf32, #tpu.memory_space<vmem>>, vector<8x128xf32>
      %12 = vector.shape_cast %11 : vector<8x128xf32> to vector<1x8x128xf32>
      %cst = arith.constant dense<0.000000e+00> : vector<1xf32>
      %13 = vector.multi_reduction <add>, %12, %cst [1, 2] : vector<1x8x128xf32> to vector<1xf32>
      %14 = vector.shape_cast %13 : vector<1xf32> to vector<1x1x1xf32>
      %15 = vector.extract %14[0, 0, 0] : f32 from vector<1x1x1xf32>
      %c0_6 = arith.constant 0 : index
      %c0_7 = arith.constant 0 : index
      %16 = memref.load %arg4[%c0_6, %c0_7] : memref<1x2xf32, #tpu.memory_space<smem>>
      memref.store %15, %arg4[%c0_6, %c0_7] : memref<1x2xf32, #tpu.memory_space<smem>>
      %c0_8 = arith.constant 0 : index
      %c0_9 = arith.constant 0 : index
      %17 = vector.load %arg6[%c0_8, %c0_9] : memref<8x128xf32, #tpu.memory_space<vmem>>, vector<8x128xf32>
      %18 = vector.shape_cast %17 : vector<8x128xf32> to vector<1x8x128xf32>
      %cst_10 = arith.constant dense<0.000000e+00> : vector<1xf32>
      %19 = vector.multi_reduction <add>, %18, %cst_10 [1, 2] : vector<1x8x128xf32> to vector<1xf32>
      %20 = vector.shape_cast %19 : vector<1xf32> to vector<1x1x1xf32>
      %21 = vector.extract %20[0, 0, 0] : f32 from vector<1x1x1xf32>
      %c0_11 = arith.constant 0 : index
      %c1 = arith.constant 1 : index
      %22 = memref.load %arg4[%c0_11, %c1] : memref<1x2xf32, #tpu.memory_space<smem>>
      memref.store %21, %arg4[%c0_11, %c1] : memref<1x2xf32, #tpu.memory_space<smem>>
    } else {
    }
    return
  }
  func.func @transform_0(%arg0: i32, %arg1: i32) -> (i32, i32) {
    %c1_i32 = arith.constant 1 : i32
    %0 = arith.muli %arg0, %c1_i32 : i32
    %1 = arith.addi %0, %arg1 : i32
    %c0_i32 = arith.constant 0 : i32
    %2 = arith.minsi %1, %c0_i32 : i32
    %c0_i32_0 = arith.constant 0 : i32
    %c0_i32_1 = arith.constant 0 : i32
    return %2, %c0_i32_0 : i32, i32
  }
  func.func @transform_1(%arg0: i32, %arg1: i32) -> (i32, i32) {
    %c1_i32 = arith.constant 1 : i32
    %0 = arith.muli %arg0, %c1_i32 : i32
    %1 = arith.addi %0, %arg1 : i32
    %c0_i32 = arith.constant 0 : i32
    %2 = arith.minsi %1, %c0_i32 : i32
    %c0_i32_0 = arith.constant 0 : i32
    %c0_i32_1 = arith.constant 0 : i32
    return %2, %c0_i32_0 : i32, i32
  }
  func.func @transform_2(%arg0: i32, %arg1: i32) -> (i32, i32) {
    %c0_i32 = arith.constant 0 : i32
    %c0_i32_0 = arith.constant 0 : i32
    return %arg0, %c0_i32 : i32, i32
  }
}

</mosaic_0001>

<bundles_post_ra>
// kernel: tpu_custom_call.1
= control target key start
LH: loop header
LB: loop body
LE: loop exit
PB: predicated region body
PF: predicated region fallthrough
CT: control target
= control target key end

     0   :  { %7 = vsyncpa [#allocation5], 0  ;;  %s243_s0 = inlined_call_operand.hbm [shape: f32[16,128], index: 0, kind: input, shape index: {}]   ;;  %s244_s1 = inlined_call_operand.hbm [shape: f32[16,128], index: 1, kind: input, shape index: {}]   ;;  %s245_s2 = inlined_call_operand.hbm [shape: f32[1,2], index: 2, kind: output, shape index: {}]  }
   0x1   :  { %8 = vsyncpa [#allocation8], 0 }
   0x2   :  { %9 = vsyncpa [#allocation6], 0  ;;  %s214_s9 = smov [#allocation4]  }
   0x3   :  { %s21_s10 = sshll.u32 %s214_s9, 4  ;;  %s22_s10 = int_to_ptr.vmem [resolvable:$true] %s21_s10 }
   0x4   :  { %s168_s11 = scalar_lea.vmem %s22_s10, 256  ;;  %p173_p1 = scmp.lt.s32.totalorder %s22_s10, %s22_s10 }
   0x5   :  { %p169_p0 = scmp.ne.s32.totalorder %s22_s10, %s168_s11  ;;  %p174_p2 = scmp.lt.s32.totalorder %s168_s11, %s168_s11 }
   0x7   :  { %p175_p3 = por %p174_p2, %p173_p1 }
   0x9   :  { %p176_p4 = pnand %p175_p3, %p169_p0 }
   0xb   :  { %179 = shalt.err (!%p176_p4)
}
   0xc   :  { %s215_s12 = smov 128   ;;  %s216_s13 = smov 8  }
   0xd   :  { %27 = dma.hbm_to_vmem [thread:$0]  %s243_s0, 256, %s22_s10, [#allocation5], %s215_s12, %s215_s12, %s216_s13  }
   0xe   :  { %s217_s16 = smov [#allocation7]  }
   0xf   :  { %s39_s17 = sshll.u32 %s217_s16, 4  ;;  %s40_s17 = int_to_ptr.vmem [resolvable:$true] %s39_s17 }
  0x10   :  { %s188_s18 = scalar_lea.vmem %s40_s17, 256  ;;  %p193_p6 = scmp.lt.s32.totalorder %s40_s17, %s40_s17 }
  0x11   :  { %p189_p5 = scmp.ne.s32.totalorder %s40_s17, %s188_s18  ;;  %p194_p7 = scmp.lt.s32.totalorder %s188_s18, %s188_s18 }
  0x13   :  { %p195_p8 = por %p194_p7, %p193_p6 }
  0x15   :  { %p196_p9 = pnand %p195_p8, %p189_p5 }
  0x17   :  { %199 = shalt.err (!%p196_p9)
}
  0x18   :  { %45 = dma.hbm_to_vmem [thread:$0]  %s244_s1, 256, %s40_s17, [#allocation8], %s215_s12, %s215_s12, %s216_s13  }
  0x19   :  { %208 = dma.done.wait [#allocation5], 256  }
  0x1a   :  { %209 = vsyncadd [#allocation5], 4294967040 }
  0x1b   :  { %210 = dma.done.wait [#allocation8], 256  }
  0x1c   :  { %211 = vsyncadd [#allocation8], 4294967040  ;;  %v71_v0 = vld [vmem:[#allocation4] sm:$0xff]  ;;  %v72_v1 = vld [vmem:[#allocation4 + $0x8] sm:$0xff]  ;;  %s218_s21 = smov [#allocation9]  }
  0x1d   :  { %v75_v2 = vsub.f32 0.0, %v71_v0  ;;  %v76_v3 = vsub.f32 0.0, %v72_v1  ;;  %v73_v10 = vld [vmem:[#allocation7] sm:$0xff]  ;;  %v74_v11 = vld [vmem:[#allocation7 + $0x8] sm:$0xff] }
  0x1f   :  { %v77_v4 = vmul.f32 1.442695, %v75_v2  ;;  %v79_v5 = vmul.f32 1.442695, %v76_v3 }
  0x21   :  { %152 = vpow2.f32 %v77_v4 }
  0x22   :  { %154 = vpow2.f32 %v79_v5 }
  0x2e   :  { %v153_v6 = vpop.eup %152 }
  0x2f   :  { %v155_v7 = vpop.eup %154  ;;  %v81_v8 = vadd.f32 1.0, %v153_v6 }
  0x30   :  { %v82_v9 = vadd.f32 1.0, %v155_v7 }
  0x31   :  { %156 = vrcp.f32 %v81_v8 }
  0x32   :  { %158 = vrcp.f32 %v82_v9 }
  0x3e   :  { %v157_v12 = vpop.eup %156 }
  0x3f   :  { %v159_v13 = vpop.eup %158  ;;  %v86_v14 = vmul.f32 %v157_v12, %v73_v10  ;;  %v92_v16 = vadd.f32 %v157_v12, %v73_v10 }
  0x40   :  { %v87_v15 = vmul.f32 %v159_v13, %v74_v11  ;;  %v93_v17 = vadd.f32 %v159_v13, %v74_v11 }
  0x42   :  { %v88_v18 = vadd.f32 %v87_v15, %v86_v14  ;;  %v94_v19 = vadd.f32 %v93_v17, %v92_v16 }
  0x44   :  { %101 = vadd.xlane.f32.xlu0 %v88_v18 }
  0x48   :  { %113 = vadd.xlane.f32.xlu0 %v94_v19 }
  0xcd   :  { %v102_v20 = vpop.xlane.xlu0 %101 }
  0xce   :  { %v103_v21 = vrot.slane %v102_v20, 4 }
  0xd0   :  { %v104_v22 = vadd.f32 %v103_v21, %v102_v20 }
  0xd1   :  { %v114_v23 = vpop.xlane.xlu0 %113 }
  0xd2   :  { %v105_v24 = vrot.slane %v104_v22, 2  ;;  %v115_v25 = vrot.slane %v114_v23, 4 }
  0xd4   :  { %v116_v26 = vadd.f32 %v115_v25, %v114_v23  ;;  %v106_v27 = vadd.f32 %v105_v24, %v104_v22 }
  0xd6   :  { %v117_v28 = vrot.slane %v116_v26, 2  ;;  %v107_v29 = vrot.slane %v106_v27, 1 }
  0xd8   :  { %v118_v30 = vadd.f32 %v117_v28, %v116_v26  ;;  %v108_v31 = vadd.f32 %v107_v29, %v106_v27 }
  0xda   :  { %143 = vpush %v108_v31  ;;  %v119_v32 = vrot.slane %v118_v30, 1 }
  0xdc   :  { %v120_v33 = vadd.f32 %v119_v32, %v118_v30 }
  0xde   :  { %145 = vpush %v120_v33 }
 0x10b   :  { %s144_s0 = spop %143 }
 0x10c   :  { %111 = sst [smem:[#allocation9]] %s144_s0 }
 0x10f   :  { %s146_s1 = spop %145 }
 0x110   :  { %123 = sst [smem:[#allocation9 + $0x1]] %s146_s1 }
 0x111   :  { %131 = dma.smem_to_hbm %s218_s21, 16, %s245_s2, [#allocation6]  }
 0x112   :  { %212 = dma.done.wait [#allocation6], 16  }
 0x113   :  { %213 = vsyncadd [#allocation6], 4294967280 }
 0x114   :  { %135 = sfence }
 0x115   :  { %136 = vsyncpa [#allocation5], 1 }
 0x116   :  { %137 = vsyncpa [#allocation8], 1 }
 0x117   :  { %138 = vsyncpa [#allocation6], 1 }

</bundles_post_ra>
